<compile_context>
chip_gen: v5e
topology: v5e:2x2
jax: 0.10.0
libtpu: 0.0.40
codegen_flags: <defaults>
</compile_context>

<pallas_src>
import jax
import jax.numpy as jnp
from jax import lax
from jax.experimental import pallas as pl
from jax.experimental.pallas import tpu as pltpu

BN_EPS = 1e-3  # matches nn.BatchNorm1d(..., eps=0.001)


def _round_up(n, m):
    return ((n + m - 1) // m) * m


def _footprint_bytes(batch, tn, tk, mm_itemsize):
    """Approximate VMEM footprint of one pipeline stage (double-buffered)."""
    return (2 * (batch * tk + tn * tk) * mm_itemsize   # x, W input blocks
            + 2 * batch * tn * 4                        # f32 output block
            + 2 * 2 * tn * 4)                           # gamma, beta blocks


def _select_tiles(batch, n_out_p, n_in_p, mm_itemsize, vmem_cap):
    """Pick (tn, tk); tk == n_in_p means 'single K pass' (fused kernel)."""
    budget = int(vmem_cap * 0.7)  # leave headroom for compiler internals

    tn_cands = [t for t in (2048, 1024, 512, 256, 128) if n_out_p % t == 0]
    if n_out_p >= 256:
        # Keep >= 2 feature tiles so the "parallel" axis can shard across the
        # two TensorCores of a v7x chip (harmless on v5e/v6e).
        multi = [t for t in tn_cands if n_out_p // t >= 2]
        if multi:
            tn_cands = multi
    tk_cands = [t for t in (2048, 1024, 512, 256, 128) if n_in_p % t == 0]

    # Prefer a single K pass: x stays resident, no accumulate/epilogue gating.
    for tn in tn_cands:
        if _footprint_bytes(batch, tn, n_in_p, mm_itemsize) <= budget:
            return tn, n_in_p
    # Otherwise tile K as well.
    for tn in tn_cands:
        for tk in tk_cands:
            if _footprint_bytes(batch, tn, tk, mm_itemsize) <= budget:
                return tn, tk
    # Minimum tiles; vmem_limit_bytes is raised to the footprint below.
    return 128, 128


def _bn_relu_sigmoid(h, gamma, beta):
    """Training-mode BatchNorm1d (+affine) -> ReLU -> sigmoid, fused.

    Single-pass batch stats (sum and sum-of-squares); the E[x^2]-mean^2
    cancellation is covered by eps=1e-3.  gamma and the mean subtraction are
    folded into one scale/shift FMA pass over the (B, tn) tile.
    """
    inv_b = 1.0 / h.shape[0]
    s1 = jnp.sum(h, axis=0, keepdims=True)
    s2 = jnp.sum(h * h, axis=0, keepdims=True)
    mean = s1 * inv_b
    var = jnp.maximum(s2 * inv_b - mean * mean, 0.0)   # guard tiny negative
    scale = gamma * lax.rsqrt(var + BN_EPS)            # fold gamma into rsqrt
    shift = beta - mean * scale                        # fold mean subtraction
    h = jnp.maximum(h * scale + shift, 0.0)            # BN affine + ReLU
    # sigmoid = 1 / (1 + exp(-h)); exp and the approximate reciprocal both go
    # to the EUP (h >= 0 after ReLU, so exp(-h) <= 1 and the denom is in [1,2]).
    return pl.reciprocal(1.0 + jnp.exp(-h), approx=True)


def _fused_kernel(x_ref, w_ref, gamma_ref, beta_ref, o_ref):
    """Single K pass: full contraction + BN/ReLU/sigmoid in one shot."""
    h = lax.dot_general(
        x_ref[...], w_ref[...],
        dimension_numbers=(((1,), (1,)), ((), ())),   # x @ W.T, W in torch layout
        preferred_element_type=jnp.float32,
    )
    o_ref[...] = _bn_relu_sigmoid(h, gamma_ref[...], beta_ref[...])


def _tiled_k_kernel(x_ref, w_ref, gamma_ref, beta_ref, o_ref):
    """K tiled: accumulate directly into the resident f32 output block."""
    k = pl.program_id(1)

    @pl.when(k == 0)
    def _init():
        o_ref[...] = jnp.zeros_like(o_ref)

    o_ref[...] += lax.dot_general(
        x_ref[...], w_ref[...],
        dimension_numbers=(((1,), (1,)), ((), ())),
        preferred_element_type=jnp.float32,
    )

    @pl.when(k == pl.num_programs(1) - 1)
    def _epilogue():
        o_ref[...] = _bn_relu_sigmoid(o_ref[...], gamma_ref[...], beta_ref[...])


def bernoulli_decoder(x, w, b, gamma, beta, *,
                      matmul_dtype=jnp.bfloat16, return_padded=False):
    """BernoulliDecoder forward (n_layers=1, dropout=0, BN training mode).

    x:     (B, n_in)      float
    w:     (n_out, n_in)  PyTorch nn.Linear weight layout (not transposed)
    b:     (n_out,)       accepted for API parity; provably cancelled by BN
    gamma: (n_out,)       BatchNorm1d.weight
    beta:  (n_out,)       BatchNorm1d.bias
    matmul_dtype: bf16 by default (MXU-native, f32 accumulation).  Pass
                  jnp.float32 for exact parity with the PyTorch module.
                  (fp8 on v7x would need a weight scale folded into gamma;
                  not plumbed here.)
    return_padded: if True and n_out is not a multiple of 128, return the
                  lane-padded (B, n_out_p) array and let the consumer slice,
                  avoiding an extra HBM pass in this wrapper.
    """
    del b  # Linear bias has zero effect under training-mode BatchNorm.

    B, n_in = x.shape
    n_out = w.shape[0]
    mm_dtype = jnp.dtype(matmul_dtype)

    # Cast matmul operands only if needed (no redundant f32 round-trip).
    if x.dtype != mm_dtype:
        x = x.astype(mm_dtype)
    if w.dtype != mm_dtype:
        w = w.astype(mm_dtype)

    gamma = jnp.asarray(gamma, jnp.float32).reshape(1, n_out)
    beta = jnp.asarray(beta, jnp.float32).reshape(1, n_out)

    # Lane-dense padding: feature dim AND contraction dim to multiples of 128.
    # Zero-padding K is exact; padded feature columns (W rows 0, gamma 1,
    # beta 0) stay finite and are sliced off below.
    n_out_p = _round_up(n_out, 128)
    n_in_p = _round_up(n_in, 128)
    if n_out_p != n_out or n_in_p != n_in:
        w = jnp.pad(w, ((0, n_out_p - n_out), (0, n_in_p - n_in)))
    if n_in_p != n_in:
        x = jnp.pad(x, ((0, 0), (0, n_in_p - n_in)))
    if n_out_p != n_out:
        gamma = jnp.pad(gamma, ((0, 0), (0, n_out_p - n_out)), constant_values=1.0)
        beta = jnp.pad(beta, ((0, 0), (0, n_out_p - n_out)))

    # Generation-aware VMEM budget (64 MiB/TC on v7x vs 128 MiB on v5e/v6e).
    try:
        vmem_cap = int(pltpu.get_tpu_info().vmem_capacity_bytes)
    except Exception:
        vmem_cap = 64 << 20  # conservative fallback (v7x per-TC)

    tn, tk = _select_tiles(B, n_out_p, n_in_p, mm_dtype.itemsize, vmem_cap)
    vmem_limit = int(min(
        vmem_cap,
        max(int(_footprint_bytes(B, tn, tk, mm_dtype.itemsize) * 1.25) + (4 << 20),
            32 << 20),
    ))

    out_shape = jax.ShapeDtypeStruct((B, n_out_p), jnp.float32)

    if tk == n_in_p:
        # Single K pass: x block index is constant -> fetched once, resident.
        grid_spec = pltpu.PrefetchScalarGridSpec(
            num_scalar_prefetch=0,
            grid=(n_out_p // tn,),
            in_specs=[
                pl.BlockSpec((B, n_in_p), lambda j: (0, 0)),    # x (resident)
                pl.BlockSpec((tn, n_in_p), lambda j: (j, 0)),   # W (torch layout)
                pl.BlockSpec((1, tn), lambda j: (0, j)),        # gamma
                pl.BlockSpec((1, tn), lambda j: (0, j)),        # beta
            ],
            out_specs=pl.BlockSpec((B, tn), lambda j: (0, j)),
        )
        kernel = _fused_kernel
        dim_sem = ("parallel",)
    else:
        grid_spec = pltpu.PrefetchScalarGridSpec(
            num_scalar_prefetch=0,
            grid=(n_out_p // tn, n_in_p // tk),
            in_specs=[
                pl.BlockSpec((B, tk), lambda j, k: (0, k)),     # x
                pl.BlockSpec((tn, tk), lambda j, k: (j, k)),    # W (torch layout)
                pl.BlockSpec((1, tn), lambda j, k: (0, j)),     # gamma
                pl.BlockSpec((1, tn), lambda j, k: (0, j)),     # beta
            ],
            out_specs=pl.BlockSpec((B, tn), lambda j, k: (0, j)),
        )
        kernel = _tiled_k_kernel
        dim_sem = ("parallel", "arbitrary")

    out = pl.pallas_call(
        kernel,
        out_shape=out_shape,
        grid_spec=grid_spec,
        compiler_params=pltpu.CompilerParams(
            dimension_semantics=dim_sem,
            vmem_limit_bytes=vmem_limit,
        ),
    )(x, w, gamma, beta)

    if return_padded or n_out_p == n_out:
        return out
    return out[:, :n_out]


if __name__ == "__main__":
    # Small shapes consistent with the module (FC decoder, n_layers=1); chosen
    # so both the feature and contraction paddings are exercised.
    B, N_IN, N_OUT = 8, 20, 100

    key = jax.random.PRNGKey(0)
    kx, kw, kb = jax.random.split(key, 3)

    x = jax.random.normal(kx, (B, N_IN), dtype=jnp.float32)

    # Deterministic parameter init (PyTorch Linear-style uniform bound).
    bound = 1.0 / (N_IN ** 0.5)
    w = jax.random.uniform(kw, (N_OUT, N_IN), jnp.float32, -bound, bound)
    b = jax.random.uniform(kb, (N_OUT,), jnp.float32, -bound, bound)
    gamma = jnp.ones((N_OUT,), jnp.float32)   # BatchNorm1d affine weight
    beta = jnp.zeros((N_OUT,), jnp.float32)   # BatchNorm1d affine bias

    # Default path: bf16 matmul, f32 accumulation.
    out = jax.block_until_ready(bernoulli_decoder(x, w, b, gamma, beta))
    assert out.shape == (B, N_OUT)
    assert bool(jnp.all(jnp.isfinite(out)))

    # Pure-JAX reference of the module forward (Linear+bias, training-mode BN,
    # ReLU, Sigmoid).
    def ref(x, w, b, gamma, beta):
        h = x @ w.T + b
        m = h.mean(axis=0, keepdims=True)
        v = ((h - m) ** 2).mean(axis=0, keepdims=True)
        h = (h - m) / jnp.sqrt(v + BN_EPS) * gamma + beta
        return jax.nn.sigmoid(jnp.maximum(h, 0.0))

    expect = ref(x, w, b, gamma, beta)

    # bf16 matmul path: loose tolerance (bf16 rounding through BN).
    assert bool(jnp.allclose(out, expect, atol=5e-2)), "bf16 path mismatch"

    # f32 opt-in parity path: tight tolerance (approx EUP reciprocal +
    # single-pass variance are the only deviations).
    out_f32 = jax.block_until_ready(
        bernoulli_decoder(x, w, b, gamma, beta, matmul_dtype=jnp.float32))
    assert bool(jnp.allclose(out_f32, expect, atol=5e-3, rtol=5e-3)), "f32 path mismatch"

    print("KERNEL_OK")
</pallas_src>

<mosaic_0001>
module attributes {stable_mosaic.version = 11 : i64} {
  func.func @_fused_kernel(%arg0: i32, %arg1: memref<8x128xbf16, #tpu.memory_space<vmem>>, %arg2: memref<128x128xbf16, #tpu.memory_space<vmem>>, %arg3: memref<1x128xf32, #tpu.memory_space<vmem>>, %arg4: memref<1x128xf32, #tpu.memory_space<vmem>>, %arg5: memref<8x128xf32, #tpu.memory_space<vmem>>) attributes {dimension_semantics = [#tpu.dimension_semantics<parallel>], iteration_bounds = array<i64: 1>, scalar_prefetch = 0 : i64, scratch_operands = 0 : i64, tpu.core_type = #tpu.core_type<tc>, window_params = [{pipeline_mode = #tpu.pipeline_mode<synchronous>, transform_indices = @transform_0, window_bounds = array<i64: 8, 128>}, {transform_indices = @transform_1, window_bounds = array<i64: 128, 128>}, {transform_indices = @transform_2, window_bounds = array<i64: 1, 128>}, {transform_indices = @transform_3, window_bounds = array<i64: 1, 128>}, {transform_indices = @transform_4, window_bounds = array<i64: 8, 128>}]} {
    %c0 = arith.constant 0 : index
    %c0_0 = arith.constant 0 : index
    %0 = vector.load %arg1[%c0, %c0_0] : memref<8x128xbf16, #tpu.memory_space<vmem>>, vector<8x128xbf16>
    %c0_1 = arith.constant 0 : index
    %c0_2 = arith.constant 0 : index
    %1 = vector.load %arg2[%c0_1, %c0_2] : memref<128x128xbf16, #tpu.memory_space<vmem>>, vector<128x128xbf16>
    %cst = arith.constant dense<0.000000e+00> : vector<8x128xf32>
    %2 = tpu.matmul %0, %1, %cst {dimension_numbers = #tpu.dot_dimension_numbers<[1], [1], [0], [0], [0, 0, 1, 0], [], []>} : vector<8x128xbf16>, vector<128x128xbf16>, vector<8x128xf32> -> vector<8x128xf32>
    %c0_3 = arith.constant 0 : index
    %c0_4 = arith.constant 0 : index
    %3 = vector.load %arg3[%c0_3, %c0_4] : memref<1x128xf32, #tpu.memory_space<vmem>>, vector<1x128xf32>
    %c0_5 = arith.constant 0 : index
    %c0_6 = arith.constant 0 : index
    %4 = vector.load %arg4[%c0_5, %c0_6] : memref<1x128xf32, #tpu.memory_space<vmem>>, vector<1x128xf32>
    %cst_7 = arith.constant dense<0.000000e+00> : vector<128xf32>
    %5 = vector.multi_reduction <add>, %2, %cst_7 [0] : vector<8x128xf32> to vector<128xf32>
    %6 = vector.shape_cast %5 : vector<128xf32> to vector<1x128xf32>
    %7 = arith.mulf %2, %2 : vector<8x128xf32>
    %cst_8 = arith.constant dense<0.000000e+00> : vector<128xf32>
    %8 = vector.multi_reduction <add>, %7, %cst_8 [0] : vector<8x128xf32> to vector<128xf32>
    %9 = vector.shape_cast %8 : vector<128xf32> to vector<1x128xf32>
    %cst_9 = arith.constant 1.250000e-01 : f32
    %10 = vector.broadcast %cst_9 : f32 to vector<1x128xf32>
    %11 = arith.mulf %6, %10 : vector<1x128xf32>
    %cst_10 = arith.constant 1.250000e-01 : f32
    %12 = vector.broadcast %cst_10 : f32 to vector<1x128xf32>
    %13 = arith.mulf %9, %12 : vector<1x128xf32>
    %14 = arith.mulf %11, %11 : vector<1x128xf32>
    %15 = arith.subf %13, %14 : vector<1x128xf32>
    %cst_11 = arith.constant 0.000000e+00 : f32
    %16 = vector.broadcast %cst_11 : f32 to vector<1x128xf32>
    %17 = arith.maximumf %15, %16 : vector<1x128xf32>
    %cst_12 = arith.constant 1.000000e-03 : f32
    %18 = vector.broadcast %cst_12 : f32 to vector<1x128xf32>
    %19 = arith.addf %17, %18 : vector<1x128xf32>
    %20 = math.rsqrt %19 : vector<1x128xf32>
    %21 = arith.mulf %3, %20 : vector<1x128xf32>
    %22 = arith.mulf %11, %21 : vector<1x128xf32>
    %23 = arith.subf %4, %22 : vector<1x128xf32>
    %24 = vector.broadcast %21 : vector<1x128xf32> to vector<8x128xf32>
    %25 = arith.mulf %2, %24 : vector<8x128xf32>
    %26 = vector.broadcast %23 : vector<1x128xf32> to vector<8x128xf32>
    %27 = arith.addf %25, %26 : vector<8x128xf32>
    %cst_13 = arith.constant 0.000000e+00 : f32
    %28 = vector.broadcast %cst_13 : f32 to vector<8x128xf32>
    %29 = arith.maximumf %27, %28 : vector<8x128xf32>
    %cst_14 = arith.constant 0.000000e+00 : f32
    %30 = vector.broadcast %cst_14 : f32 to vector<8x128xf32>
    %31 = arith.subf %30, %29 : vector<8x128xf32>
    %32 = math.exp %31 : vector<8x128xf32>
    %cst_15 = arith.constant 1.000000e+00 : f32
    %33 = vector.broadcast %cst_15 : f32 to vector<8x128xf32>
    %34 = arith.addf %33, %32 : vector<8x128xf32>
    %35 = tpu.reciprocal %34 {approx = true} : vector<8x128xf32> -> vector<8x128xf32>
    %c0_16 = arith.constant 0 : index
    %c0_17 = arith.constant 0 : index
    %36 = vector.load %arg5[%c0_16, %c0_17] : memref<8x128xf32, #tpu.memory_space<vmem>>, vector<8x128xf32>
    tpu.vector_store %arg5[%c0_16, %c0_17], %35 {strides = array<i32>} : memref<8x128xf32, #tpu.memory_space<vmem>>, vector<8x128xf32>,
    return
  }
  func.func @transform_0(%arg0: i32) -> (i32, i32) {
    %c0_i32 = arith.constant 0 : i32
    %c0_i32_0 = arith.constant 0 : i32
    %c0_i32_1 = arith.constant 0 : i32
    return %c0_i32, %c0_i32_0 : i32, i32
  }
  func.func @transform_1(%arg0: i32) -> (i32, i32) {
    %c0_i32 = arith.constant 0 : i32
    %c0_i32_0 = arith.constant 0 : i32
    return %arg0, %c0_i32 : i32, i32
  }
  func.func @transform_2(%arg0: i32) -> (i32, i32) {
    %c0_i32 = arith.constant 0 : i32
    %c0_i32_0 = arith.constant 0 : i32
    return %c0_i32, %arg0 : i32, i32
  }
  func.func @transform_3(%arg0: i32) -> (i32, i32) {
    %c0_i32 = arith.constant 0 : i32
    %c0_i32_0 = arith.constant 0 : i32
    return %c0_i32, %arg0 : i32, i32
  }
  func.func @transform_4(%arg0: i32) -> (i32, i32) {
    %c0_i32 = arith.constant 0 : i32
    %c0_i32_0 = arith.constant 0 : i32
    return %c0_i32, %arg0 : i32, i32
  }
}

</mosaic_0001>

<bundles_post_ra>
// kernel: tpu_custom_call.1
= control target key start
LH: loop header
LB: loop body
LE: loop exit
PB: predicated region body
PF: predicated region fallthrough
CT: control target
= control target key end

     0   :  { %9 = vsyncpa [#allocation3], 0  ;;  %s367_s0 = inlined_call_operand.hbm [shape: bf16[8,128], index: 0, kind: input, shape index: {}]   ;;  %s368_s1 = inlined_call_operand.hbm [shape: bf16[128,128], index: 1, kind: input, shape index: {}]   ;;  %s369_s2 = inlined_call_operand.vmem [shape: f32[1,128], index: 2, kind: input, shape index: {}]   ;;  %s370_s3 = inlined_call_operand.vmem [shape: f32[1,128], index: 3, kind: input, shape index: {}]   ;;  %s371_s4 = inlined_call_operand.hbm [shape: f32[8,128], index: 4, kind: output, shape index: {}]  }
   0x1   :  { %10 = vsyncpa [#allocation6], 0 }
   0x2   :  { %11 = vsyncpa [#allocation4], 0  ;;  %s17_s17 = sshll.u32 %s367_s0, 4  ;;  %s322_s18 = smov [#allocation2]   ;;  %s18_s17 = int_to_ptr.hbm [resolvable:$true] %s17_s17 }
   0x3   :  { %s19_s19 = sshll.u32 %s322_s18, 4  ;;  %s27_s22 = sshll.u32 %s368_s1, 4  ;;  %s20_s19 = int_to_ptr.vmem [resolvable:$true] %s19_s19  ;;  %s28_s22 = int_to_ptr.hbm [resolvable:$true] %s27_s22 }
   0x4   :  { %22 = dma.hbm_to_vmem [thread:$0]  %s18_s17, 64, %s20_s19, [#allocation3]  }
   0x5   :  { %s323_s23 = smov [#allocation5]   ;;  %s324_s25 = smov 64  }
   0x6   :  { %s29_s24 = sshll.u32 %s323_s23, 4  ;;  %s325_s26 = smov 4   ;;  %s30_s24 = int_to_ptr.vmem [resolvable:$true] %s29_s24 }
   0x7   :  { %35 = dma.hbm_to_vmem [thread:$0]  %s28_s22, 1024, %s30_s24, [#allocation6], %s324_s25, %s324_s25, %s325_s26  }
   0x8   :  { %316 = dma.done.wait [#allocation3], 64  }
   0x9   :  { %317 = vsyncadd [#allocation3], 4294967232 }
   0xa   :  { %318 = dma.done.wait [#allocation6], 1024  }
   0xb   :  { %319 = vsyncadd [#allocation6], 4294966272  ;;  %v232_v0 = vld [vmem:[#allocation5 + $0x38] sm:$0xff]  ;;  %v231_v1 = vld [vmem:[#allocation5 + $0x30] sm:$0xff]  ;;  %s182_s6 = sshll.u32 %s371_s4, 4  ;;  %s183_s6 = int_to_ptr.hbm [resolvable:$true] %s182_s6 }
   0xc   :  { %113 = vmatpush.bf16.xpose.msra.mxu0 %v232_v0  ;;  %v230_v2 = vld [vmem:[#allocation5 + $0x28] sm:$0xff]  ;;  %v229_v3 = vld [vmem:[#allocation5 + $0x20] sm:$0xff]  ;;  %v228_v4 = vld [vmem:[#allocation5 + $0x18] sm:$0xff] }
   0xd   :  { %v227_v5 = vld [vmem:[#allocation5 + $0x10] sm:$0xff]  ;;  %v226_v6 = vld [vmem:[#allocation5 + $0x8] sm:$0xff]  ;;  %v225_v7 = vld [vmem:[#allocation5] sm:$0xff] }
   0xe   :  { %v48_v8 = vld [vmem:[#allocation2] sm:$0xf] }
   0xf   :  { %v126_v35 = vld [vmem:[%s369_s2] sm:$0x1]  ;;  %s326_s2 = smov [#allocation7]  }
  0x10   :  { %v127_v39 = vld [vmem:[%s370_s3] sm:$0x1]  ;;  %s180_s29 = sshll.u32 %s326_s2, 4  ;;  %s181_s29 = int_to_ptr.vmem [resolvable:$true] %s180_s29 }
  0x14   :  { %114 = vmatpush.bf16.xpose.msra.mxu0 %v231_v1 }
  0x1c   :  { %115 = vmatpush.bf16.xpose.msra.mxu0 %v230_v2 }
  0x24   :  { %116 = vmatpush.bf16.xpose.msra.mxu0 %v229_v3 }
  0x2c   :  { %117 = vmatpush.bf16.xpose.msra.mxu0 %v228_v4 }
  0x34   :  { %118 = vmatpush.bf16.xpose.msra.mxu0 %v227_v5 }
  0x3c   :  { %119 = vmatpush.bf16.xpose.msra.mxu0 %v226_v6 }
  0x44   :  { %120 = vmatpush.bf16.xpose.msra.mxu0 %v225_v7 }
  0x4b   :  { %121 = vmatmul.bf16.vlgmr.msra.gmra.mxu0 %v48_v8 }
  0xc8   :  { %v122_v9 = vpop.f32.mrf.mxu0 }
  0xc9   :  { %v128_v10 = vrot.slane %v122_v9, 4  ;;  %v134_v11 = vmul.f32 %v122_v9, %v122_v9 }
  0xcb   :  { %v129_v12 = vadd.f32 %v128_v10, %v122_v9  ;;  %v135_v13 = vrot.slane %v134_v11, 4 }
  0xcd   :  { %v130_v14 = vrot.slane %v129_v12, 2  ;;  %v136_v15 = vadd.f32 %v135_v13, %v134_v11 }
  0xcf   :  { %v131_v16 = vadd.f32 %v130_v14, %v129_v12  ;;  %v137_v17 = vrot.slane %v136_v15, 2 }
  0xd0   :  { %v124_v18 = vpop.f32.mrf.mxu0 }
  0xd1   :  { %v132_v19 = vrot.slane %v131_v16, 1  ;;  %v138_v20 = vadd.f32 %v137_v17, %v136_v15 }
  0xd3   :  { %v133_v21 = vadd.f32 %v132_v19, %v131_v16  ;;  %v139_v22 = vrot.slane %v138_v20, 1 }
  0xd5   :  { %v140_v23 = vadd.f32 %v139_v22, %v138_v20  ;;  %v141_v24 = vmul.f32 0.125, %v133_v21 }
  0xd7   :  { %v142_v25 = vmul.f32 0.125, %v140_v23  ;;  %v143_v26 = vmul.f32 %v141_v24, %v141_v24 }
  0xd9   :  { %v144_v27 = vsub.f32 %v142_v25, %v143_v26 }
  0xdb   :  { %v145_v28 = vmax.f32 %v144_v27, 0.0 }
  0xdd   :  { %v146_v29 = vadd.f32 0.001, %v145_v28 }
  0xdf   :  { %238 = vrsqrt.f32 %v146_v29  ;;  %vm153_vm1 = vweird.f32 %v146_v29 }
  0xe5   :  { %v239_v30 = vpop.eup %238 }
  0xe6   :  { %v148_v31 = vmul.f32 %v239_v30, %v146_v29  ;;  %vm154_vm0 = vweird.f32 %v239_v30 }
  0xe7   :  { %vm155_vm2 = vmor %vm153_vm1, %vm154_vm0 }
  0xe8   :  { %v149_v32 = vmul.f32 %v239_v30, %v148_v31 }
  0xea   :  { %v150_v33 = vmul.f32 0.5, %v149_v32 }
  0xec   :  { %v151_v34 = vsub.f32 1.5, %v150_v33 }
  0xee   :  { %v152_v36 = vmul.f32 %v239_v30, %v151_v34 }
  0xf0   :  { %v156_v37 = vsel %vm155_vm2, %v239_v30, %v152_v36 }
  0xf1   :  { %v157_v38 = vmul.f32 %v156_v37, %v126_v35 }
  0xf3   :  { %v158_v40 = vmul.f32 %v157_v38, %v141_v24  ;;  %v161_v41 = vperm.slane %v157_v38, 0 }
  0xf5   :  { %v159_v42 = vsub.f32 %v127_v39, %v158_v40  ;;  %v163_v43 = vmul.f32 %v161_v41, %v122_v9 }
  0xf7   :  { %v165_v44 = vperm.slane %v159_v42, 0 }
  0xf9   :  { %v167_v45 = vadd.f32 %v165_v44, %v163_v43 }
  0xfb   :  { %v168_v46 = vmax.f32 %v167_v45, 0.0 }
  0xfd   :  { %v169_v47 = vsub.f32 0.0, %v168_v46 }
  0xff   :  { %v170_v48 = vmul.f32 1.442695, %v169_v47 }
 0x101   :  { %240 = vpow2.f32 %v170_v48 }
 0x107   :  { %v241_v49 = vpop.eup %240 }
 0x108   :  { %v172_v50 = vadd.f32 1.0, %v241_v49 }
 0x10a   :  { %242 = vrcp.f32 %v172_v50 }
 0x110   :  { %v243_v51 = vpop.eup %242 }
 0x111   :  { %174 = vst [vmem:[#allocation7] sm:$0xff] %v243_v51 }
 0x112   :  { %185 = dma.vmem_to_hbm [thread:$0]  %s181_s29, 128, %s183_s6, [#allocation4]  }
 0x113   :  { %320 = dma.done.wait [#allocation4], 128  }
 0x114   :  { %321 = vsyncadd [#allocation4], 4294967168 }
 0x115   :  { %190 = vsyncpa [#allocation3], 1 }
 0x116   :  { %191 = vsyncpa [#allocation6], 1 }
 0x117   :  { %192 = vsyncpa [#allocation4], 1 }

</bundles_post_ra>
